<compile_context>
chip_gen: v7x
topology: tpu7x:2x2x1
jax: 0.10.0
libtpu: 0.0.40
codegen_flags: <defaults>
</compile_context>

<pallas_src>
import functools

import jax
import jax.numpy as jnp
from jax.experimental import pallas as pl
from jax.experimental.pallas import tpu as pltpu


def _cls_head_kernel(x_ref, wd_ref, bd_ref, wo_ref, bo_ref, out_ref):
    # x_ref:  [TB, H] (bf16)   wd_ref: [H, M] (bf16)  bd_ref: [1, M]  (f32)
    # wo_ref: [M, Lp] (bf16)   bo_ref: [1, Lp] (f32)  out_ref: [TB, Lp]
    x = x_ref[...]
    # dense + tanh (dropout is identity at inference); f32 accumulate, f32 tanh.
    h = jnp.dot(x, wd_ref[...], preferred_element_type=jnp.float32)
    h = jnp.tanh(h + bd_ref[...])
    # out_proj: downcast the f32 tanh output to the weight compute dtype for the MXU.
    o = jnp.dot(h.astype(wo_ref.dtype), wo_ref[...],
                preferred_element_type=jnp.float32)
    out_ref[...] = (o + bo_ref[...]).astype(out_ref.dtype)


def _round_up(x, m):
    return ((x + m - 1) // m) * m


@functools.partial(jax.jit, static_argnames=("block_b", "compute_dtype"))
def roberta_classification_head(features, dense_w, dense_b, out_w, out_b,
                                *, block_b=128, compute_dtype=jnp.bfloat16):
    """features: [B, H]; dense_w: [H, M]; dense_b: [M]; out_w: [M, L]; out_b: [L]."""
    B, H = features.shape
    M = dense_w.shape[1]
    L = out_w.shape[1]
    out_dtype = features.dtype

    # --- Padding / tiling choices -------------------------------------------
    # Batch tile: multiple of 8 (sublane), capped by the (padded) batch size.
    TB = min(_round_up(block_b, 8), _round_up(B, 8))
    Bp = _round_up(B, TB)
    # Label dim padded to a lane-dense multiple of 128 (removes masked stores,
    # fills MXU columns); sliced back to L at the end.
    Lp = _round_up(L, 128)

    # --- Prepare operands (cast + pad in the wrapper) ------------------------
    x = features.astype(compute_dtype)
    if Bp != B:
        x = jnp.pad(x, ((0, Bp - B), (0, 0)))
    wd = dense_w.astype(compute_dtype)                       # [H, M]
    bd = dense_b.astype(jnp.float32).reshape(1, M)           # bias/tanh stay f32
    wo = out_w.astype(compute_dtype)                         # [M, L]
    bo = out_b.astype(jnp.float32).reshape(1, L)
    if Lp != L:
        wo = jnp.pad(wo, ((0, 0), (0, Lp - L)))
        bo = jnp.pad(bo, ((0, 0), (0, Lp - L)))

    grid = (Bp // TB,)

    out = pl.pallas_call(
        _cls_head_kernel,
        out_shape=jax.ShapeDtypeStruct((Bp, Lp), out_dtype),
        grid=grid,
        in_specs=[
            pl.BlockSpec((TB, H), lambda i: (i, 0)),   # streamed per batch tile
            pl.BlockSpec((H, M), lambda i: (0, 0)),    # VMEM-resident weights
            pl.BlockSpec((1, M), lambda i: (0, 0)),
            pl.BlockSpec((M, Lp), lambda i: (0, 0)),
            pl.BlockSpec((1, Lp), lambda i: (0, 0)),
        ],
        out_specs=pl.BlockSpec((TB, Lp), lambda i: (i, 0)),
        compiler_params=pltpu.CompilerParams(
            dimension_semantics=("parallel",),
        ),
    )(x, wd, bd, wo, bo)

    return out[:B, :L]


def _reference(features, dense_w, dense_b, out_w, out_b,
               compute_dtype=jnp.bfloat16):
    # Matches the kernel's numerics: bf16 matmul inputs, f32 accumulation,
    # f32 bias add and tanh.
    x = features.astype(compute_dtype)
    wd = dense_w.astype(compute_dtype)
    wo = out_w.astype(compute_dtype)
    h = jnp.dot(x, wd, preferred_element_type=jnp.float32) + dense_b.astype(jnp.float32)
    h = jnp.tanh(h)
    o = jnp.dot(h.astype(compute_dtype), wo, preferred_element_type=jnp.float32)
    o = o + out_b.astype(jnp.float32)
    return o.astype(features.dtype)


if __name__ == "__main__":
    # Small shapes consistent with the module (hidden -> MLP hidden -> labels).
    # NOTE: these toy sizes are for correctness only; benchmark/tune at
    # H = M = 1024 and a realistic batch, where dims are (8,128)-aligned.
    B = 8            # batch of feature rows (module accepts a matrix input)
    H = 32           # bert_hidden_dim (scaled down from 1024)
    M = 64           # MLP_hidden_dim (scaled down from 1024)
    L = 4            # num_labels

    key = jax.random.PRNGKey(0)
    k_x, k_wd, k_bd, k_wo, k_bo = jax.random.split(key, 5)

    features = jax.random.normal(k_x, (B, H), dtype=jnp.float32)
    # Deterministic parameter init (Linear weights stored transposed: [in, out]).
    dense_w = jax.random.normal(k_wd, (H, M), dtype=jnp.float32) * 0.02
    dense_b = jax.random.normal(k_bd, (M,), dtype=jnp.float32) * 0.02
    out_w = jax.random.normal(k_wo, (M, L), dtype=jnp.float32) * 0.02
    out_b = jax.random.normal(k_bo, (L,), dtype=jnp.float32) * 0.02

    out = roberta_classification_head(features, dense_w, dense_b, out_w, out_b)
    out = jax.block_until_ready(out)

    ref = _reference(features, dense_w, dense_b, out_w, out_b)
    assert out.shape == (B, L)
    assert jnp.allclose(out, ref, atol=1e-3, rtol=1e-3), (
        f"max abs diff = {jnp.max(jnp.abs(out - ref))}")

    print("KERNEL_OK")
</pallas_src>

<mosaic_0001>
module attributes {stable_mosaic.version = 11 : i64} {
  func.func @_cls_head_kernel(%arg0: i32, %arg1: memref<8x32xbf16, #tpu.memory_space<vmem>>, %arg2: memref<32x64xbf16, #tpu.memory_space<vmem>>, %arg3: memref<1x64xf32, #tpu.memory_space<vmem>>, %arg4: memref<64x128xbf16, #tpu.memory_space<vmem>>, %arg5: memref<1x128xf32, #tpu.memory_space<vmem>>, %arg6: memref<8x128xf32, #tpu.memory_space<vmem>>) attributes {dimension_semantics = [#tpu.dimension_semantics<parallel>], iteration_bounds = array<i64: 1>, scalar_prefetch = 0 : i64, scratch_operands = 0 : i64, tpu.core_type = #tpu.core_type<tc>, window_params = [{transform_indices = @transform_0, window_bounds = array<i64: 8, 32>}, {pipeline_mode = #tpu.pipeline_mode<synchronous>, transform_indices = @transform_1, window_bounds = array<i64: 32, 64>}, {pipeline_mode = #tpu.pipeline_mode<synchronous>, transform_indices = @transform_2, window_bounds = array<i64: 1, 64>}, {pipeline_mode = #tpu.pipeline_mode<synchronous>, transform_indices = @transform_3, window_bounds = array<i64: 64, 128>}, {pipeline_mode = #tpu.pipeline_mode<synchronous>, transform_indices = @transform_4, window_bounds = array<i64: 1, 128>}, {transform_indices = @transform_5, window_bounds = array<i64: 8, 128>}]} {
    %c0 = arith.constant 0 : index
    %c0_0 = arith.constant 0 : index
    %0 = vector.load %arg1[%c0, %c0_0] : memref<8x32xbf16, #tpu.memory_space<vmem>>, vector<8x32xbf16>
    %c0_1 = arith.constant 0 : index
    %c0_2 = arith.constant 0 : index
    %1 = vector.load %arg2[%c0_1, %c0_2] : memref<32x64xbf16, #tpu.memory_space<vmem>>, vector<32x64xbf16>
    %cst = arith.constant dense<0.000000e+00> : vector<8x64xf32>
    %2 = tpu.matmul %0, %1, %cst {dimension_numbers = #tpu.dot_dimension_numbers<[1], [0], [0], [1], [0, 0, 1, 1], [], []>} : vector<8x32xbf16>, vector<32x64xbf16>, vector<8x64xf32> -> vector<8x64xf32>
    %c0_3 = arith.constant 0 : index
    %c0_4 = arith.constant 0 : index
    %3 = vector.load %arg3[%c0_3, %c0_4] : memref<1x64xf32, #tpu.memory_space<vmem>>, vector<1x64xf32>
    %4 = vector.broadcast %3 : vector<1x64xf32> to vector<8x64xf32>
    %5 = arith.addf %2, %4 : vector<8x64xf32>
    %6 = math.tanh %5 : vector<8x64xf32>
    %7 = arith.truncf %6 : vector<8x64xf32> to vector<8x64xbf16>
    %c0_5 = arith.constant 0 : index
    %c0_6 = arith.constant 0 : index
    %8 = vector.load %arg4[%c0_5, %c0_6] : memref<64x128xbf16, #tpu.memory_space<vmem>>, vector<64x128xbf16>
    %cst_7 = arith.constant dense<0.000000e+00> : vector<8x128xf32>
    %9 = tpu.matmul %7, %8, %cst_7 {dimension_numbers = #tpu.dot_dimension_numbers<[1], [0], [0], [1], [0, 0, 1, 1], [], []>} : vector<8x64xbf16>, vector<64x128xbf16>, vector<8x128xf32> -> vector<8x128xf32>
    %c0_8 = arith.constant 0 : index
    %c0_9 = arith.constant 0 : index
    %10 = vector.load %arg5[%c0_8, %c0_9] : memref<1x128xf32, #tpu.memory_space<vmem>>, vector<1x128xf32>
    %11 = vector.broadcast %10 : vector<1x128xf32> to vector<8x128xf32>
    %12 = arith.addf %9, %11 : vector<8x128xf32>
    %c0_10 = arith.constant 0 : index
    %c0_11 = arith.constant 0 : index
    %13 = vector.load %arg6[%c0_10, %c0_11] : memref<8x128xf32, #tpu.memory_space<vmem>>, vector<8x128xf32>
    tpu.vector_store %arg6[%c0_10, %c0_11], %12 {strides = array<i32>} : memref<8x128xf32, #tpu.memory_space<vmem>>, vector<8x128xf32>,
    return
  }
  func.func @transform_0(%arg0: i32) -> (i32, i32) {
    %c0_i32 = arith.constant 0 : i32
    %c0_i32_0 = arith.constant 0 : i32
    return %arg0, %c0_i32 : i32, i32
  }
  func.func @transform_1(%arg0: i32) -> (i32, i32) {
    %c0_i32 = arith.constant 0 : i32
    %c0_i32_0 = arith.constant 0 : i32
    %c0_i32_1 = arith.constant 0 : i32
    return %c0_i32, %c0_i32_0 : i32, i32
  }
  func.func @transform_2(%arg0: i32) -> (i32, i32) {
    %c0_i32 = arith.constant 0 : i32
    %c0_i32_0 = arith.constant 0 : i32
    %c0_i32_1 = arith.constant 0 : i32
    return %c0_i32, %c0_i32_0 : i32, i32
  }
  func.func @transform_3(%arg0: i32) -> (i32, i32) {
    %c0_i32 = arith.constant 0 : i32
    %c0_i32_0 = arith.constant 0 : i32
    %c0_i32_1 = arith.constant 0 : i32
    return %c0_i32, %c0_i32_0 : i32, i32
  }
  func.func @transform_4(%arg0: i32) -> (i32, i32) {
    %c0_i32 = arith.constant 0 : i32
    %c0_i32_0 = arith.constant 0 : i32
    %c0_i32_1 = arith.constant 0 : i32
    return %c0_i32, %c0_i32_0 : i32, i32
  }
  func.func @transform_5(%arg0: i32) -> (i32, i32) {
    %c0_i32 = arith.constant 0 : i32
    %c0_i32_0 = arith.constant 0 : i32
    return %arg0, %c0_i32 : i32, i32
  }
}

</mosaic_0001>

<bundles_post_ra>
// kernel: roberta_classification_head.1
= control target key start
LH: loop header
LB: loop body
LE: loop exit
PB: predicated region body
PF: predicated region fallthrough
CT: control target
= control target key end

     0   :  { %v227_v0 = vmov 0.0   ;;  %vm228_vm0 = vmmov 0   ;;  %vm45_vm1 = vcmask 261120   ;;  %vm130_vm2 = vcmask 523264   ;;  %s289_s1 = inlined_call_operand.vmem [shape: bf16[32,64], index: 1, kind: input, shape index: {}]   ;;  %s290_s0 = inlined_call_operand.vmem [shape: bf16[8,32], index: 0, kind: input, shape index: {}]   ;;  %s291_s3 = inlined_call_operand.vmem [shape: bf16[64,128], index: 3, kind: input, shape index: {}]   ;;  %s292_s2 = inlined_call_operand.vmem [shape: f32[1,64], index: 2, kind: input, shape index: {}]   ;;  %s293_s4 = inlined_call_operand.vmem [shape: f32[1,128], index: 4, kind: input, shape index: {}]   ;;  %s294_s5 = inlined_call_operand.vmem [shape: f32[8,128], index: 5, kind: output, shape index: {}]  }
   0x1   :  { %197 = vmatprep.subr.bf16.mxu0 %v227_v0  ;;  %v219_v1 = vld [vmem:[%s289_s1] sm:$0xff]   ;;  %201 = vmatprep.mubr.msk.bf16.mxu0 %vm228_vm0, %v227_v0  ;;  %v220_v2 = vld [vmem:[%s289_s1 + $0x8] sm:$0xff]   ;;  %v223_v6 = vld [vmem:[%s291_s3 + $0x10] sm:$0xff]  }
   0x2   :  { %205 = vmatprep.subr.bf16.mxu1 %v227_v0  ;;  %213 = vmatprep.mubr.msk.bf16.mxu1 %vm228_vm0, %v227_v0  ;;  %v21_v3 = vld [vmem:[%s290_s0] sm:$0xf]  ;;  %v222_v5 = vld [vmem:[%s291_s3 + $0x8] sm:$0xff]   ;;  %v224_v7 = vld [vmem:[%s291_s3 + $0x18] sm:$0xff]  }
   0x3   :  { %198 = vmatpush3.bf16.msra.mxu0 %v219_v1  ;;  %v221_v4 = vld [vmem:[%s291_s3] sm:$0xff]  }
   0x4   :  { %199 = vmatprep.subr.bf16.mxu0 %v227_v0  ;;  %206 = vmatpush3.bf16.msra.mxu1 %v221_v4  ;;  %v179_v8 = vld [vmem:[%s292_s2] ss:$0 sm:$0xff] }
   0x5   :  { %207 = vmatprep.subr.bf16.mxu1 %v227_v0  ;;  %v183_v16 = vld [vmem:[%s293_s4] ss:$0 sm:$0xff] }
   0x7   :  { %200 = vmatpush3.bf16.msra.mxu0 %v220_v2 }
   0x8   :  { %208 = vmatpush3.bf16.msra.mxu1 %v222_v5 }
   0x9   :  { %209 = vmatprep.subr.bf16.mxu1 %v227_v0 }
   0xa   :  { %202 = vmatmul.mubr.msk.bf16.vlgmr.msra.gmra.mrb[0].mxu0 %vm45_vm1, %v21_v3 }
   0xc   :  { %210 = vmatpush3.bf16.msra.mxu1 %v223_v6 }
   0xd   :  { %211 = vmatprep.subr.bf16.mxu1 %v227_v0 }
  0x10   :  { %212 = vmatpush3.bf16.msra.mxu1 %v224_v7 }
  0xdd   :  { %v83_v9 = vpop.f32.mrb[0].mxu0 }
  0xde   :  { %v84_v10 = vadd.f32 %v179_v8, %v83_v9  ;;  %v203_v11 = vpop.f32.mrb[1].mxu0 }
  0xdf   :  { %v86_v12 = vpop.f32.mrb[2].mxu0 }
  0xe0   :  { %225 = vtanh.f32 %v84_v10  ;;  %v204_v13 = vpop.f32.mrb[3].mxu0 }
  0xea   :  { %v226_v14 = vpop.eup %225 }
  0xeb   :  { %v90_v15 = vpack.c.bf16 %v226_v14, %v226_v14 }
  0xed   :  { %214 = vmatmul.mubr.msk.bf16.vlgmr.msra.gmra.mrb[0].mxu1 %vm130_vm2, %v90_v15 }
 0x1c0   :  { %v168_v17 = vpop.f32.mrb[0].mxu1 }
 0x1c1   :  { %v169_v18 = vadd.f32 %v183_v16, %v168_v17  ;;  %v215_v19 = vpop.f32.mrb[1].mxu1 }
 0x1c2   :  { %v171_v20 = vpop.f32.mrb[2].mxu1 }
 0x1c3   :  { %174 = vst [vmem:[%s294_s5] sm:$0xff] %v169_v18  ;;  %v216_v21 = vpop.f32.mrb[3].mxu1 }

</bundles_post_ra>
